<compile_context>
chip_gen: v7x
topology: tpu7x:2x2x1
jax: 0.10.0
libtpu: 0.0.40
codegen_flags: <defaults>
</compile_context>

<pallas_src>
import jax
import jax.numpy as jnp
from jax.experimental import pallas as pl
from jax.experimental.pallas import tpu as pltpu

LANE = 128     # hidden-layer lane padding (full vreg width)
OUT_PAD = 8    # output-layer padding: one sublane group; (TB, 8) block is legal and lean


def _round_up(x, m):
    return ((x + m - 1) // m) * m


# --------------------------------------------------------------------------- kernel
def _critic_kernel(s_ref, a_ref, w1s_ref, w1a_ref, w2_ref, w3_ref, b_ref, o_ref):
    # packed biases: row0 = b1, row1 = b2, row2[:OUT_PAD] = b3 (zero padded) — all f32
    b = b_ref[...]

    # layer 1 ("split W1"): two small dots into one f32 accumulator, no [s;a] concat
    h = jnp.dot(s_ref[...], w1s_ref[...], preferred_element_type=jnp.float32)
    h = h + jnp.dot(a_ref[...], w1a_ref[...], preferred_element_type=jnp.float32)
    h = jnp.maximum(h + b[0:1, :], 0.0)

    # layer 2: (TB, 128) @ (128, 128)
    h = jnp.dot(h, w2_ref[...], preferred_element_type=jnp.float32)
    h = jnp.maximum(h + b[1:2, :], 0.0)

    # output layer: (TB, 128) @ (128, 8) — only column 0 is real; padding columns stay 0
    out = jnp.dot(h, w3_ref[...], preferred_element_type=jnp.float32) + b[2:3, 0:OUT_PAD]
    o_ref[...] = out.astype(o_ref.dtype)


# --------------------------------------------------------------------------- wrapper
def critic_forward(state, action, params, *, block_b=1024):
    """Q(s, a) forward with lane-padded f32 params from init_critic_params.
    Returns (B, 1) float32."""
    w1s, w1a, w2, w3, b_all = params
    state = state.astype(jnp.float32)
    action = action.astype(jnp.float32)

    B, Ks = state.shape
    Ka = action.shape[1]
    H = w2.shape[1]      # padded hidden width (128)
    O = w3.shape[1]      # padded output width (8)

    # Balanced batch tiling: n_tiles ≈ B/block_b, TB a multiple of 8; batch padding is
    # at most 7 rows (no near-full padded tail tile).
    n_tiles = pl.cdiv(B, block_b)
    TB = _round_up(pl.cdiv(B, n_tiles), 8)
    B_pad = _round_up(B, TB)
    if B_pad != B:
        pad = ((0, B_pad - B), (0, 0))
        state = jnp.pad(state, pad)
        action = jnp.pad(action, pad)
    grid = (B_pad // TB,)

    flops = 2 * B_pad * (Ks * H + Ka * H + H * H + H * O)
    bytes_accessed = (
        (B_pad * (Ks + Ka) + B_pad * O) * 4
        + sum(int(p.size) * p.dtype.itemsize for p in params)
    )

    out = pl.pallas_call(
        _critic_kernel,
        out_shape=jax.ShapeDtypeStruct((B_pad, O), jnp.float32),
        grid_spec=pl.GridSpec(
            grid=grid,
            in_specs=[
                pl.BlockSpec((TB, Ks), lambda i: (i, 0)),     # state tile (batch-tiled)
                pl.BlockSpec((TB, Ka), lambda i: (i, 0)),     # action tile (batch-tiled)
                pl.BlockSpec(w1s.shape, lambda i: (0, 0)),    # weights/biases: grid-invariant
                pl.BlockSpec(w1a.shape, lambda i: (0, 0)),    #   (kept resident across tiles)
                pl.BlockSpec(w2.shape, lambda i: (0, 0)),
                pl.BlockSpec(w3.shape, lambda i: (0, 0)),
                pl.BlockSpec(b_all.shape, lambda i: (0, 0)),
            ],
            out_specs=pl.BlockSpec((TB, O), lambda i: (i, 0)),  # narrow (TB, 8) f32 output
        ),
        # TODO(synk): on v7x verify the batch grid actually shards across both TensorCores;
        # if "parallel" alone doesn't, switch to pltpu.CORE_PARALLEL / pl.core_map and keep
        # at least 2 tiles in the grid.
        compiler_params=pltpu.CompilerParams(
            dimension_semantics=("parallel",)),
        cost_estimate=pl.CostEstimate(
            flops=flops, transcendentals=0, bytes_accessed=bytes_accessed),
    )(state, action, w1s, w1a, w2, w3, b_all)

    # Padded batch rows carry bias-propagated junk; padded output columns are exact zeros.
    return out[:B, :1]


# --------------------------------------------------------------------------- params
def init_critic_params(key, state_dim, action_dim, hidden_sizes):
    """Torch-style Linear init (U(-1/sqrt(fan_in), 1/sqrt(fan_in))) for
    [state+action -> h1 -> h2 -> 1], then zero-pad feature dims (hidden -> 128,
    output -> 8), split W1 into its state/action row blocks, and pack the biases
    into one (3, 128) f32 tile.  Zero padding keeps the math exact.

    Returns (padded_params, raw_params):
      padded_params = (w1s, w1a, w2, w3, b_all), all float32
      raw_params    = [(W, b), ...] unpadded float32 (reference checking)
    """
    assert len(hidden_sizes) == 2, "kernel is specialized for two hidden layers"
    dims = [state_dim + action_dim] + list(hidden_sizes) + [1]
    keys = jax.random.split(key, len(dims) - 1)

    raw = []
    for k, (din, dout) in zip(keys, zip(dims[:-1], dims[1:])):
        kw, kb = jax.random.split(k)
        bound = 1.0 / (din ** 0.5)
        w = jax.random.uniform(kw, (din, dout), jnp.float32, -bound, bound)
        b = jax.random.uniform(kb, (dout,), jnp.float32, -bound, bound)
        raw.append((w, b))

    (w1, b1), (w2, b2), (w3, b3) = raw
    h1, h2 = hidden_sizes
    h1p = _round_up(h1, LANE)                    # 32 -> 128
    h2p = _round_up(h2, LANE)                    # 32 -> 128

    w1_p = jnp.zeros((dims[0], h1p), jnp.float32).at[:, :h1].set(w1)
    w1s = w1_p[:state_dim, :]                    # (state_dim, 128)
    w1a = w1_p[state_dim:, :]                    # (action_dim, 128)
    w2_p = jnp.zeros((h1p, h2p), jnp.float32).at[:h1, :h2].set(w2)
    w3_p = jnp.zeros((h2p, OUT_PAD), jnp.float32).at[:h2, :1].set(w3)

    b_all = jnp.zeros((3, h2p), jnp.float32)
    b_all = b_all.at[0, :h1].set(b1)
    b_all = b_all.at[1, :h2].set(b2)
    b_all = b_all.at[2, 0].set(b3[0])

    return (w1s, w1a, w2_p, w3_p, b_all), raw


# --------------------------------------------------------------------------- reference
def critic_reference_fp32(state, action, raw_params):
    """Full-precision, unpadded reference of the original torch module's math."""
    x = jnp.concatenate([state, action], axis=-1)
    for w, b in raw_params[:-1]:
        x = jnp.maximum(jnp.dot(x, w, precision=jax.lax.Precision.HIGHEST) + b, 0.0)
    w, b = raw_params[-1]
    return jnp.dot(x, w, precision=jax.lax.Precision.HIGHEST) + b


# --------------------------------------------------------------------------- main
if __name__ == "__main__":
    # shapes from the module spec: Critic(state_dim=12, action_dim=4,
    # hidden_sizes=[32, 32], activation="ReLU")
    state_dim, action_dim = 12, 4
    hidden_sizes = [32, 32]
    batch = 8

    key = jax.random.PRNGKey(0)
    k_s, k_a, k_p = jax.random.split(key, 3)
    state = jax.random.normal(k_s, (batch, state_dim), jnp.float32)
    action = jax.random.normal(k_a, (batch, action_dim), jnp.float32)
    params, raw_params = init_critic_params(k_p, state_dim, action_dim, hidden_sizes)

    out = jax.block_until_ready(critic_forward(state, action, params))
    assert out.shape == (batch, 1)

    ref = critic_reference_fp32(state, action, raw_params)
    assert jnp.allclose(out, ref, atol=2e-3, rtol=2e-3), "mismatch vs f32 reference"

    print("KERNEL_OK")
</pallas_src>

<mosaic_0001>
module attributes {stable_mosaic.version = 11 : i64} {
  func.func @_critic_kernel(%arg0: i32, %arg1: memref<8x12xf32, #tpu.memory_space<vmem>>, %arg2: memref<8x4xf32, #tpu.memory_space<vmem>>, %arg3: memref<12x128xf32, #tpu.memory_space<vmem>>, %arg4: memref<4x128xf32, #tpu.memory_space<vmem>>, %arg5: memref<128x128xf32, #tpu.memory_space<vmem>>, %arg6: memref<128x8xf32, #tpu.memory_space<vmem>>, %arg7: memref<3x128xf32, #tpu.memory_space<vmem>>, %arg8: memref<8x8xf32, #tpu.memory_space<vmem>>) attributes {dimension_semantics = [#tpu.dimension_semantics<parallel>], iteration_bounds = array<i64: 1>, scalar_prefetch = 0 : i64, scratch_operands = 0 : i64, tpu.core_type = #tpu.core_type<tc>, window_params = [{transform_indices = @transform_0, window_bounds = array<i64: 8, 12>}, {transform_indices = @transform_1, window_bounds = array<i64: 8, 4>}, {pipeline_mode = #tpu.pipeline_mode<synchronous>, transform_indices = @transform_2, window_bounds = array<i64: 12, 128>}, {pipeline_mode = #tpu.pipeline_mode<synchronous>, transform_indices = @transform_3, window_bounds = array<i64: 4, 128>}, {pipeline_mode = #tpu.pipeline_mode<synchronous>, transform_indices = @transform_4, window_bounds = array<i64: 128, 128>}, {pipeline_mode = #tpu.pipeline_mode<synchronous>, transform_indices = @transform_5, window_bounds = array<i64: 128, 8>}, {pipeline_mode = #tpu.pipeline_mode<synchronous>, transform_indices = @transform_6, window_bounds = array<i64: 3, 128>}, {transform_indices = @transform_7, window_bounds = array<i64: 8, 8>}]} {
    %c0 = arith.constant 0 : index
    %c0_0 = arith.constant 0 : index
    %0 = vector.load %arg7[%c0, %c0_0] : memref<3x128xf32, #tpu.memory_space<vmem>>, vector<3x128xf32>
    %c0_1 = arith.constant 0 : index
    %c0_2 = arith.constant 0 : index
    %1 = vector.load %arg1[%c0_1, %c0_2] : memref<8x12xf32, #tpu.memory_space<vmem>>, vector<8x12xf32>
    %c0_3 = arith.constant 0 : index
    %c0_4 = arith.constant 0 : index
    %2 = vector.load %arg3[%c0_3, %c0_4] : memref<12x128xf32, #tpu.memory_space<vmem>>, vector<12x128xf32>
    %cst = arith.constant dense<0.000000e+00> : vector<8x128xf32>
    %3 = tpu.matmul %1, %2, %cst {dimension_numbers = #tpu.dot_dimension_numbers<[1], [0], [0], [1], [0, 0, 1, 1], [], []>} : vector<8x12xf32>, vector<12x128xf32>, vector<8x128xf32> -> vector<8x128xf32>
    %c0_5 = arith.constant 0 : index
    %c0_6 = arith.constant 0 : index
    %4 = vector.load %arg2[%c0_5, %c0_6] : memref<8x4xf32, #tpu.memory_space<vmem>>, vector<8x4xf32>
    %c0_7 = arith.constant 0 : index
    %c0_8 = arith.constant 0 : index
    %5 = vector.load %arg4[%c0_7, %c0_8] : memref<4x128xf32, #tpu.memory_space<vmem>>, vector<4x128xf32>
    %cst_9 = arith.constant dense<0.000000e+00> : vector<8x128xf32>
    %6 = tpu.matmul %4, %5, %cst_9 {dimension_numbers = #tpu.dot_dimension_numbers<[1], [0], [0], [1], [0, 0, 1, 1], [], []>} : vector<8x4xf32>, vector<4x128xf32>, vector<8x128xf32> -> vector<8x128xf32>
    %7 = arith.addf %3, %6 : vector<8x128xf32>
    %8 = vector.extract_strided_slice %0 {offsets = [0, 0], sizes = [1, 128], strides = [1, 1]} : vector<3x128xf32> to vector<1x128xf32>
    %9 = vector.broadcast %8 : vector<1x128xf32> to vector<8x128xf32>
    %10 = arith.addf %7, %9 : vector<8x128xf32>
    %cst_10 = arith.constant 0.000000e+00 : f32
    %11 = vector.broadcast %cst_10 : f32 to vector<8x128xf32>
    %12 = arith.maximumf %10, %11 : vector<8x128xf32>
    %c0_11 = arith.constant 0 : index
    %c0_12 = arith.constant 0 : index
    %13 = vector.load %arg5[%c0_11, %c0_12] : memref<128x128xf32, #tpu.memory_space<vmem>>, vector<128x128xf32>
    %cst_13 = arith.constant dense<0.000000e+00> : vector<8x128xf32>
    %14 = tpu.matmul %12, %13, %cst_13 {dimension_numbers = #tpu.dot_dimension_numbers<[1], [0], [0], [1], [0, 0, 1, 1], [], []>} : vector<8x128xf32>, vector<128x128xf32>, vector<8x128xf32> -> vector<8x128xf32>
    %15 = vector.extract_strided_slice %0 {offsets = [1, 0], sizes = [1, 128], strides = [1, 1]} : vector<3x128xf32> to vector<1x128xf32>
    %16 = vector.broadcast %15 : vector<1x128xf32> to vector<8x128xf32>
    %17 = arith.addf %14, %16 : vector<8x128xf32>
    %cst_14 = arith.constant 0.000000e+00 : f32
    %18 = vector.broadcast %cst_14 : f32 to vector<8x128xf32>
    %19 = arith.maximumf %17, %18 : vector<8x128xf32>
    %c0_15 = arith.constant 0 : index
    %c0_16 = arith.constant 0 : index
    %20 = vector.load %arg6[%c0_15, %c0_16] : memref<128x8xf32, #tpu.memory_space<vmem>>, vector<128x8xf32>
    %cst_17 = arith.constant dense<0.000000e+00> : vector<8x8xf32>
    %21 = tpu.matmul %19, %20, %cst_17 {dimension_numbers = #tpu.dot_dimension_numbers<[1], [0], [0], [1], [0, 0, 1, 1], [], []>} : vector<8x128xf32>, vector<128x8xf32>, vector<8x8xf32> -> vector<8x8xf32>
    %22 = vector.extract_strided_slice %0 {offsets = [2, 0], sizes = [1, 8], strides = [1, 1]} : vector<3x128xf32> to vector<1x8xf32>
    %23 = vector.broadcast %22 : vector<1x8xf32> to vector<8x8xf32>
    %24 = arith.addf %21, %23 : vector<8x8xf32>
    %c0_18 = arith.constant 0 : index
    %c0_19 = arith.constant 0 : index
    %25 = vector.load %arg8[%c0_18, %c0_19] : memref<8x8xf32, #tpu.memory_space<vmem>>, vector<8x8xf32>
    tpu.vector_store %arg8[%c0_18, %c0_19], %24 {strides = array<i32>} : memref<8x8xf32, #tpu.memory_space<vmem>>, vector<8x8xf32>,
    return
  }
  func.func @transform_0(%arg0: i32) -> (i32, i32) {
    %c0_i32 = arith.constant 0 : i32
    %c0_i32_0 = arith.constant 0 : i32
    return %arg0, %c0_i32 : i32, i32
  }
  func.func @transform_1(%arg0: i32) -> (i32, i32) {
    %c0_i32 = arith.constant 0 : i32
    %c0_i32_0 = arith.constant 0 : i32
    return %arg0, %c0_i32 : i32, i32
  }
  func.func @transform_2(%arg0: i32) -> (i32, i32) {
    %c0_i32 = arith.constant 0 : i32
    %c0_i32_0 = arith.constant 0 : i32
    %c0_i32_1 = arith.constant 0 : i32
    return %c0_i32, %c0_i32_0 : i32, i32
  }
  func.func @transform_3(%arg0: i32) -> (i32, i32) {
    %c0_i32 = arith.constant 0 : i32
    %c0_i32_0 = arith.constant 0 : i32
    %c0_i32_1 = arith.constant 0 : i32
    return %c0_i32, %c0_i32_0 : i32, i32
  }
  func.func @transform_4(%arg0: i32) -> (i32, i32) {
    %c0_i32 = arith.constant 0 : i32
    %c0_i32_0 = arith.constant 0 : i32
    %c0_i32_1 = arith.constant 0 : i32
    return %c0_i32, %c0_i32_0 : i32, i32
  }
  func.func @transform_5(%arg0: i32) -> (i32, i32) {
    %c0_i32 = arith.constant 0 : i32
    %c0_i32_0 = arith.constant 0 : i32
    %c0_i32_1 = arith.constant 0 : i32
    return %c0_i32, %c0_i32_0 : i32, i32
  }
  func.func @transform_6(%arg0: i32) -> (i32, i32) {
    %c0_i32 = arith.constant 0 : i32
    %c0_i32_0 = arith.constant 0 : i32
    %c0_i32_1 = arith.constant 0 : i32
    return %c0_i32, %c0_i32_0 : i32, i32
  }
  func.func @transform_7(%arg0: i32) -> (i32, i32) {
    %c0_i32 = arith.constant 0 : i32
    %c0_i32_0 = arith.constant 0 : i32
    return %arg0, %c0_i32 : i32, i32
  }
}

</mosaic_0001>

<bundles_post_ra>
// kernel: tpu_custom_call.1
= control target key start
LH: loop header
LB: loop body
LE: loop exit
PB: predicated region body
PF: predicated region fallthrough
CT: control target
= control target key end

     0   :  { %vm37_vm0 = vcmask 1043456   ;;  %v597_v2 = vmov 0.0|0.0   ;;  %v598_v3 = vmov 0.0   ;;  %vm33_vm1 = vcmask 31744   ;;  %s789_s0 = inlined_call_operand.vmem [shape: f32[8,12], index: 0, kind: input, shape index: {}]   ;;  %s790_s1 = inlined_call_operand.vmem [shape: f32[8,4], index: 1, kind: input, shape index: {}]   ;;  %s791_s2 = inlined_call_operand.vmem [shape: f32[12,128], index: 2, kind: input, shape index: {}]   ;;  %s792_s3 = inlined_call_operand.vmem [shape: f32[4,128], index: 3, kind: input, shape index: {}]   ;;  %s793_s4 = inlined_call_operand.vmem [shape: f32[128,128], index: 4, kind: input, shape index: {}]   ;;  %s794_s5 = inlined_call_operand.vmem [shape: f32[128,8], index: 5, kind: input, shape index: {}]   ;;  %s795_s6 = inlined_call_operand.vmem [shape: f32[3,128], index: 6, kind: input, shape index: {}]   ;;  %s796_s7 = inlined_call_operand.hbm [shape: f32[8,8], index: 7, kind: output, shape index: {}]  }
   0x1   :  { %v29_v0 = vld [vmem:[%s791_s2] sm:$0xff]  ;;  %v30_v1 = vld [vmem:[%s791_s2 + $0x8] sm:$0xf]  ;;  %516 = vmatprep.subr.bf16.mxu1 %v597_v2  ;;  %434 = vmatprep.subr.mxu0 %v598_v3  ;;  %vm599_vm2 = vmmov 1   ;;  %vm600_vm4 = vmmov 0   ;;  %vm111_vm5 = vcmask 97280  }
   0x2   :  { %v517_v4 = vpack.c.bf16 %v30_v1, %v29_v0  ;;  %v32_v5 = vld [vmem:[%s792_s3] sm:$0xf]  ;;  %vm518_vm3 = vmpackc.low %vm37_vm0, %vm599_vm2  ;;  %436 = vmatprep.mubr.msk.f32.mxu0 %vm600_vm4, %v598_v3  ;;  %v195_v9 = vld [vmem:[%s793_s4 + $0x8] sm:$0xff]  ;;  %443 = vmatprep.mubr.msk.f32.mxu1 %vm600_vm4, %v598_v3 }
   0x3   :  { %v31_v6 = vld [vmem:[%s790_s1] sm:$0xff]  ;;  %435 = vmatpush3.msk.msra.mxu0 %vm37_vm0, %v32_v5  ;;  %v196_v10 = vld [vmem:[%s793_s4 + $0x10] sm:$0xff]  ;;  %v197_v11 = vld [vmem:[%s793_s4 + $0x18] sm:$0xff] }
   0x4   :  { %v28_v7 = vld [vmem:[%s789_s0] sm:$0xff]  ;;  %519 = vmatpush3.bf16.msk.msra.mxu1 %vm518_vm3, %v517_v4  ;;  %437 = vmatmul.mubr.msk.f32.vlgmr.msra.gmra.mrb[0].mxu0 %vm33_vm1, %v31_v6  ;;  %v524_v13 = vpack.c.bf16 %v197_v11, %v196_v10 }
   0x5   :  { %v194_v8 = vld [vmem:[%s793_s4] sm:$0xff]  ;;  %520 = vmatprep.subr.bf16.mxu0 %v597_v2  ;;  %478 = vmatprep.mubr.msk.f32.mxu0 %vm600_vm4, %v598_v3 }
   0x6   :  { %v521_v12 = vpack.c.bf16 %v195_v9, %v194_v8  ;;  %544 = vmatprep.subr.bf16.mxu1 %v597_v2 }
   0x7   :  { %444 = vmatmul.mubr.msk.f32.vlgmr.msra.gmra.mrb[0].mxu1 %vm111_vm5, %v28_v7 }
   0x8   :  { %522 = vmatpush3.bf16.msra.mxu0 %v521_v12 }
   0x9   :  { %12 = vsyncpa [#allocation3], 0  ;;  %523 = vmatprep.subr.bf16.mxu0 %v597_v2  ;;  %v198_v14 = vld [vmem:[%s793_s4 + $0x20] sm:$0xff]  ;;  %v199_v15 = vld [vmem:[%s793_s4 + $0x28] sm:$0xff]  ;;  %513 = vmatprep.mubr.msk.f32.mxu1 %vm600_vm4, %v598_v3  ;;  %v188_v53 = vlaneseq  ;;  %vm375_vm6 = vcmask 64512  }
   0xa   :  { %v527_v16 = vpack.c.bf16 %v199_v15, %v198_v14  ;;  %v200_v17 = vld [vmem:[%s793_s4 + $0x30] sm:$0xff]  ;;  %v201_v18 = vld [vmem:[%s793_s4 + $0x38] sm:$0xff]  ;;  %v202_v20 = vld [vmem:[%s793_s4 + $0x40] sm:$0xff] }
   0xb   :  { %v530_v19 = vpack.c.bf16 %v201_v18, %v200_v17  ;;  %v203_v21 = vld [vmem:[%s793_s4 + $0x48] sm:$0xff]  ;;  %v204_v23 = vld [vmem:[%s793_s4 + $0x50] sm:$0xff]  ;;  %v205_v24 = vld [vmem:[%s793_s4 + $0x58] sm:$0xff]  ;;  %v189_v54 = vshrl.u32 %v188_v53, 7 }
   0xc   :  { %525 = vmatpush3.bf16.msra.mxu0 %v524_v13  ;;  %v533_v22 = vpack.c.bf16 %v203_v21, %v202_v20  ;;  %v536_v25 = vpack.c.bf16 %v205_v24, %v204_v23  ;;  %v206_v26 = vld [vmem:[%s793_s4 + $0x60] sm:$0xff]  ;;  %v207_v27 = vld [vmem:[%s793_s4 + $0x68] sm:$0xff]  ;;  %v208_v29 = vld [vmem:[%s793_s4 + $0x70] sm:$0xff] }
   0xd   :  { %526 = vmatprep.subr.bf16.mxu0 %v597_v2  ;;  %v539_v28 = vpack.c.bf16 %v207_v27, %v206_v26  ;;  %v209_v30 = vld [vmem:[%s793_s4 + $0x78] sm:$0xff]  ;;  %v285_v32 = vld [vmem:[%s794_s5] sm:$0xff]  ;;  %v286_v33 = vld [vmem:[%s794_s5 + $0x8] sm:$0xff]  ;;  %v190_v55 = vsub.s32 0, %v189_v54  ;;  %v212_v4 = vsub.s32 1, %v189_v54  ;;  %v303_v10 = vsub.s32 2, %v189_v54 }
   0xe   :  { %v542_v31 = vpack.c.bf16 %v209_v30, %v208_v29  ;;  %v287_v34 = vld [vmem:[%s794_s5 + $0x10] sm:$0xff]  ;;  %v545_v35 = vpack.c.bf16 %v286_v33, %v285_v32  ;;  %v288_v36 = vld [vmem:[%s794_s5 + $0x18] sm:$0xff]  ;;  %v289_v38 = vld [vmem:[%s794_s5 + $0x20] sm:$0xff] }
   0xf   :  { %v548_v37 = vpack.c.bf16 %v288_v36, %v287_v34  ;;  %v290_v39 = vld [vmem:[%s794_s5 + $0x28] sm:$0xff]  ;;  %v291_v41 = vld [vmem:[%s794_s5 + $0x30] sm:$0xff]  ;;  %v292_v42 = vld [vmem:[%s794_s5 + $0x38] sm:$0xff] }
  0x10   :  { %528 = vmatpush3.bf16.msra.mxu0 %v527_v16  ;;  %546 = vmatpush3.bf16.msra.mxu1 %v545_v35  ;;  %v551_v40 = vpack.c.bf16 %v290_v39, %v289_v38  ;;  %v554_v43 = vpack.c.bf16 %v292_v42, %v291_v41  ;;  %v293_v44 = vld [vmem:[%s794_s5 + $0x40] sm:$0xff]  ;;  %v294_v45 = vld [vmem:[%s794_s5 + $0x48] sm:$0xff]  ;;  %v295_v47 = vld [vmem:[%s794_s5 + $0x50] sm:$0xff] }
  0x11   :  { %529 = vmatprep.subr.bf16.mxu0 %v597_v2  ;;  %547 = vmatprep.subr.bf16.mxu1 %v597_v2  ;;  %v557_v46 = vpack.c.bf16 %v294_v45, %v293_v44  ;;  %v296_v48 = vld [vmem:[%s794_s5 + $0x58] sm:$0xff]  ;;  %v297_v50 = vld [vmem:[%s794_s5 + $0x60] sm:$0xff]  ;;  %v298_v51 = vld [vmem:[%s794_s5 + $0x68] sm:$0xff] }
  0x12   :  { %v560_v49 = vpack.c.bf16 %v296_v48, %v295_v47  ;;  %v563_v52 = vpack.c.bf16 %v298_v51, %v297_v50  ;;  %v27_v56 = vld [vmem:[%s795_s6] sm:$0x7]  ;;  %v299_v1 = vld [vmem:[%s794_s5 + $0x70] sm:$0xff]  ;;  %s601_s6 = smov [#allocation2]  }
  0x13   :  { %v191_v59 = vrot.slane %v27_v56, %v190_v55  ;;  %v213_v5 = vrot.slane %v27_v56, %v212_v4  ;;  %v304_v11 = vrot.slane %v27_v56, %v303_v10  ;;  %s383_s18 = sshll.u32 %s601_s6, 4  ;;  %s384_s18 = int_to_ptr.vmem [resolvable:$true] %s383_s18 }
  0x14   :  { %531 = vmatpush3.bf16.msra.mxu0 %v530_v19  ;;  %549 = vmatpush3.bf16.msra.mxu1 %v548_v37  ;;  %p578_p1 = scmp.lt.s32.totalorder %s384_s18, %s384_s18 }
  0x15   :  { %532 = vmatprep.subr.bf16.mxu0 %v597_v2  ;;  %550 = vmatprep.subr.bf16.mxu1 %v597_v2 }
  0x18   :  { %534 = vmatpush3.bf16.msra.mxu0 %v533_v22  ;;  %552 = vmatpush3.bf16.msra.mxu1 %v551_v40 }
  0x19   :  { %535 = vmatprep.subr.bf16.mxu0 %v597_v2  ;;  %553 = vmatprep.subr.bf16.mxu1 %v597_v2 }
  0x1c   :  { %537 = vmatpush3.bf16.msra.mxu0 %v536_v25  ;;  %555 = vmatpush3.bf16.msra.mxu1 %v554_v43 }
  0x1d   :  { %538 = vmatprep.subr.bf16.mxu0 %v597_v2  ;;  %556 = vmatprep.subr.bf16.mxu1 %v597_v2 }
  0x20   :  { %540 = vmatpush3.bf16.msra.mxu0 %v539_v28  ;;  %558 = vmatpush3.bf16.msra.mxu1 %v557_v46 }
  0x21   :  { %541 = vmatprep.subr.bf16.mxu0 %v597_v2  ;;  %559 = vmatprep.subr.bf16.mxu1 %v597_v2 }
  0x24   :  { %543 = vmatpush3.bf16.msra.mxu0 %v542_v31  ;;  %561 = vmatpush3.bf16.msra.mxu1 %v560_v49 }
  0x25   :  { %562 = vmatprep.subr.bf16.mxu1 %v597_v2 }
  0x28   :  { %564 = vmatpush3.bf16.msra.mxu1 %v563_v52 }
  0x29   :  { %565 = vmatprep.subr.bf16.mxu1 %v597_v2  ;;  %v300_v2 = vld [vmem:[%s794_s5 + $0x78] sm:$0xff]  ;;  %s573_s5 = scalar_lea.vmem %s384_s18, 128 }
  0x2a   :  { %v566_v3 = vpack.c.bf16 %v300_v2, %v299_v1  ;;  %p574_p0 = scmp.ne.s32.totalorder %s384_s18, %s573_s5  ;;  %p579_p2 = scmp.lt.s32.totalorder %s573_s5, %s573_s5 }
  0x2c   :  { %567 = vmatpush3.bf16.msra.mxu1 %v566_v3  ;;  %p580_p3 = por %p579_p2, %p578_p1 }
  0x2e   :  { %p581_p4 = pnand %p580_p3, %p574_p0 }
  0xd7   :  { %v107_v57 = vpop.f32.mrb[0].mxu0 }
  0xd8   :  { %v438_v58 = vpop.f32.mrb[1].mxu0 }
  0xda   :  { %v184_v60 = vpop.f32.mrb[0].mxu1 }
  0xdb   :  { %v185_v61 = vadd.f32 %v184_v60, %v107_v57  ;;  %v445_v62 = vpop.f32.mrb[1].mxu1 }
  0xdd   :  { %v192_v63 = vadd.f32 %v191_v59, %v185_v61 }
  0xdf   :  { %v193_v0 = vmax.f32 %v192_v63, 0.0 }
  0xe1   :  { %479 = vmatmul.mubr.f32.vlgmr.msra.gmra.mrb[2].mxu0 %v193_v0 }
 0x1b4   :  { %v280_v6 = vpop.f32.mrb[2].mxu0 }
 0x1b5   :  { %v281_v7 = vadd.f32 %v280_v6, %v213_v5  ;;  %v480_v8 = vpop.f32.mrb[3].mxu0 }
 0x1b7   :  { %v284_v9 = vmax.f32 %v281_v7, 0.0 }
 0x1b9   :  { %514 = vmatmul.mubr.f32.vlgmr.msra.gmra.mrb[2].mxu1 %v284_v9 }
 0x28c   :  { %v371_v12 = vpop.f32.mrb[2].mxu1 }
 0x28d   :  { %v372_v13 = vadd.f32 %v371_v12, %v304_v11  ;;  %v515_v14 = vpop.f32.mrb[3].mxu1 }
 0x28f   :  { %376 = vst.msk [vmem:[#allocation2] sm:$0xff] %vm375_vm6, %v372_v13 }
 0x290   :  { %584 = shalt.err (!%p581_p4)
}
 0x291   :  { %s585_s20 = scalar_lea.hbm %s796_s7, 128 }
 0x292   :  { %p586_p5 = scmp.ne.s32.totalorder %s796_s7, %s585_s20  ;;  %p589_p6 = scmp.lt.u32.totalorder %s585_s20, %s796_s7 }
 0x294   :  { %p591_p7 = pnand %p589_p6, %p586_p5 }
 0x296   :  { %594 = shalt.err (!%p591_p7)
}
 0x297   :  { %386 = dma.vmem_to_hbm [thread:$0]  %s384_s18, 128, %s796_s7, [#allocation3]  }
 0x298   :  { %595 = dma.done.wait [#allocation3], 128  }
 0x299   :  { %596 = vsyncadd [#allocation3], 4294967168 }
 0x29a   :  { %390 = vsyncpa [#allocation3], 1 }

</bundles_post_ra>
